<compile_context>
chip_gen: v7x
topology: tpu7x:2x2x1
jax: 0.10.0
libtpu: 0.0.40
codegen_flags: <defaults>
</compile_context>

<pallas_src>
import jax
import jax.numpy as jnp
import numpy as np
from jax.experimental import pallas as pl
from jax.experimental.pallas import tpu as pltpu


# ----------------------------------------------------------------------------
# Shared epilogue: bias + ReLU, psi projection (VPU mul + sublane reduce),
# sigmoid gate, lane-dense store dtype cast.  All math in f32.
# ----------------------------------------------------------------------------
def _gate_epilogue(x, acc, bxg, wp, bp, out_dtype):
    r = jnp.maximum(acc + bxg, 0.0)                         # (F_int, t_hw) f32
    logit = jnp.sum(r * wp, axis=0, keepdims=True) + bp     # (1, t_hw) f32
    psi = jax.nn.sigmoid(logit)                             # EUP
    return (x * psi).astype(out_dtype)                      # broadcast over sublanes


# ----------------------------------------------------------------------------
# Kernel A (fused, channel counts sublane-aligned):
#   x_ref : (1, F_l, t_hw)   g_ref : (1, F_g, t_hw)
#   w_ref : (F_int, F_l+F_g) packed [wx | wg] (folded conv+BN), activation dtype
#   bxg   : (F_int, 1) f32   wp : (F_int, 1) f32   bp : (1, 1) f32
# ----------------------------------------------------------------------------
def attn_gate_kernel_fused(x_ref, g_ref, w_ref, bxg_ref, wp_ref, bp_ref, o_ref):
    x = x_ref[0]                                            # (F_l, t_hw)
    g = g_ref[0]                                            # (F_g, t_hw)
    xg = jnp.concatenate([x, g], axis=0)                    # sublane concat
    acc = jnp.dot(w_ref[...], xg, preferred_element_type=jnp.float32)
    o_ref[0] = _gate_epilogue(x, acc, bxg_ref[...], wp_ref[...], bp_ref[...],
                              o_ref.dtype)


# ----------------------------------------------------------------------------
# Kernel B (split, safe for unaligned channel counts): two dots written as an
# accumulate so the v7x MRB can fold the add into the MXU result path.
# ----------------------------------------------------------------------------
def attn_gate_kernel_split(x_ref, g_ref, wx_ref, wg_ref,
                           bxg_ref, wp_ref, bp_ref, o_ref):
    x = x_ref[0]                                            # (F_l, t_hw)
    g = g_ref[0]                                            # (F_g, t_hw)
    acc = jnp.dot(wx_ref[...], x, preferred_element_type=jnp.float32)
    acc += jnp.dot(wg_ref[...], g, preferred_element_type=jnp.float32)
    o_ref[0] = _gate_epilogue(x, acc, bxg_ref[...], wp_ref[...], bp_ref[...],
                              o_ref.dtype)


# ----------------------------------------------------------------------------
# Generation-aware VMEM capacity (falls back to v7x's 64 MiB if unavailable).
# ----------------------------------------------------------------------------
def _vmem_capacity_bytes():
    try:
        info = pltpu.get_tpu_info()
        for attr in ("vmem_capacity_bytes", "vmem_size_bytes", "vmem_bytes"):
            v = getattr(info, attr, None)
            if v:
                return int(v)
    except Exception:
        pass
    return 64 << 20


def _bytes_per_spatial_col(f_l, f_g, f_int, itemsize):
    """VMEM bytes per spatial column: streams (double-buffered) + f32 temps."""
    return (2 * itemsize * (2 * f_l + f_g)      # x + out + g, double-buffered
            + 4 * (2 * f_int + f_l)             # f32 acc/relu + gated product
            + itemsize * (f_l + f_g))           # concat scratch (fused path)


def _pick_spatial_tile(hw, f_l, f_g, f_int, itemsize, vmem_cap):
    """Largest lane-aligned spatial tile fitting a gen-aware VMEM budget."""
    if hw <= 1024:
        return hw                               # single block == full extent
    big = vmem_cap >= (100 << 20)               # v5e/v6e: 128 MiB; v7x: 64 MiB
    target_bytes = (56 << 20) if big else (24 << 20)
    tile_cap = 8192 if big else 2048
    bpc = _bytes_per_spatial_col(f_l, f_g, f_int, itemsize)
    t = (target_bytes // max(bpc, 1)) // 128 * 128
    return int(max(128, min(t, tile_cap)))


# ----------------------------------------------------------------------------
# Wrapper.
# ----------------------------------------------------------------------------
def attention_gate_pallas(x_nchw, g_nchw, params, *, t_hw=None):
    """x_nchw: (N, F_l, H, W), g_nchw: (N, F_g, H, W) -> (N, F_l, H, W).

    For best perf feed bf16 x/g: the folded weights follow the activation
    dtype (native-bf16 MXU path, half the HBM bytes); accumulation stays f32.
    """
    N, F_l, H, W = x_nchw.shape
    Ng, F_g, Hg, Wg = g_nchw.shape
    assert (N, H, W) == (Ng, Hg, Wg)
    F_int = params["wx"].shape[0]
    HW = H * W

    x_r = x_nchw.reshape(N, F_l, HW)            # free reshape, no transpose
    g_r = g_nchw.reshape(N, F_g, HW)

    act_dtype = x_nchw.dtype
    itemsize = jnp.dtype(act_dtype).itemsize
    vmem_cap = _vmem_capacity_bytes()

    if t_hw is None:
        t_hw = _pick_spatial_tile(HW, F_l, F_g, F_int, itemsize, vmem_cap)
    n_hw = pl.cdiv(HW, t_hw)

    # v7x megacore: make sure both TensorCores get work when possible.
    if N * n_hw < 2 and HW > 128:
        half = -(-HW // 2)                      # ceil(HW / 2)
        t_hw = max(128, -(-half // 128) * 128)  # round up to lane multiple
        n_hw = pl.cdiv(HW, t_hw)

    # VMEM limit: streamed blocks (double-buffered) + f32 intermediates +
    # resident (double-buffered) weights, with headroom; capped below the
    # physical VMEM of the current generation.
    block_bytes = t_hw * _bytes_per_spatial_col(F_l, F_g, F_int, itemsize)
    weight_bytes = 2 * (itemsize * F_int * (F_l + F_g) + 4 * (2 * F_int + 1))
    vmem_limit = int(min(max(block_bytes + weight_bytes + (2 << 20), 8 << 20),
                         vmem_cap - (8 << 20)))

    # Per-channel params: fused bias (bx+bg) and psi weight as separate
    # (F_int, 1) f32 operands (no per-step lane slicing of a packed aux).
    bxg = (params["bx"] + params["bg"]).astype(jnp.float32)[:, None]   # (F_int,1)
    wp = params["wp"].astype(jnp.float32).reshape(F_int, 1)            # (F_int,1)
    bp = params["bp"].reshape(1, 1).astype(jnp.float32)                # (1,1)

    row_spec = lambda C: pl.BlockSpec((1, C, t_hw), lambda n, p: (n, 0, p))
    full_spec = lambda r, c: pl.BlockSpec((r, c), lambda n, p: (0, 0))

    # Fused single-matmul path only when the in-kernel sublane concat is
    # tile-aligned for this dtype; otherwise the safe two-dot accumulate path.
    sub_align = 8 * max(4 // itemsize, 1)       # 8 (f32) / 16 (bf16) / 32 (i8)
    fused = (F_l % sub_align == 0) and (F_g % sub_align == 0)

    if fused:
        kernel = attn_gate_kernel_fused
        w_cat = jnp.concatenate([params["wx"], params["wg"]],
                                axis=1).astype(act_dtype)   # (F_int, F_l+F_g)
        w_args = (w_cat,)
        w_specs = [full_spec(F_int, F_l + F_g)]
    else:
        kernel = attn_gate_kernel_split
        w_args = (params["wx"].astype(act_dtype), params["wg"].astype(act_dtype))
        w_specs = [full_spec(F_int, F_l), full_spec(F_int, F_g)]

    out_r = pl.pallas_call(
        kernel,
        out_shape=jax.ShapeDtypeStruct((N, F_l, HW), act_dtype),
        grid=(N, n_hw),
        in_specs=[row_spec(F_l), row_spec(F_g)] + w_specs + [
            full_spec(F_int, 1),    # bxg
            full_spec(F_int, 1),    # wp
            full_spec(1, 1),        # bp
        ],
        out_specs=row_spec(F_l),
        compiler_params=pltpu.CompilerParams(
            dimension_semantics=("parallel", "parallel"),
            vmem_limit_bytes=vmem_limit),
    )(x_r, g_r, *w_args, bxg, wp, bp)

    return out_r.reshape(N, F_l, H, W)


# ----------------------------------------------------------------------------
# Parameter construction (deterministic) + BN folding (inference mode).
# ----------------------------------------------------------------------------
def fold_conv_bn(w, b, gamma, beta, mean, var, eps=1e-5):
    """w: (C_out, C_in), b: (C_out,). Returns folded (w, b) for y = w @ x + b."""
    scale = gamma / jnp.sqrt(var + eps)
    return w * scale[:, None], (b - mean) * scale + beta


def make_params(key, F_g, F_l, F_int):
    ks = jax.random.split(key, 16)
    f32 = jnp.float32

    def conv_w(k, cout, cin):
        return jax.random.normal(k, (cout, cin), f32) * 0.1

    # W_x branch: Conv2d(F_l, F_int, 1) + BN(F_int)
    wx = conv_w(ks[0], F_int, F_l)
    bx = jax.random.normal(ks[1], (F_int,), f32) * 0.05
    gx = 1.0 + 0.1 * jax.random.normal(ks[2], (F_int,), f32)
    btx = 0.05 * jax.random.normal(ks[3], (F_int,), f32)
    mx = 0.05 * jax.random.normal(ks[4], (F_int,), f32)
    vx = 1.0 + 0.1 * jnp.abs(jax.random.normal(ks[5], (F_int,), f32))

    # W_g branch: Conv2d(F_g, F_int, 1) + BN(F_int)
    wg = conv_w(ks[6], F_int, F_g)
    bg = jax.random.normal(ks[7], (F_int,), f32) * 0.05
    gg = 1.0 + 0.1 * jax.random.normal(ks[8], (F_int,), f32)
    btg = 0.05 * jax.random.normal(ks[9], (F_int,), f32)
    mg = 0.05 * jax.random.normal(ks[10], (F_int,), f32)
    vg = 1.0 + 0.1 * jnp.abs(jax.random.normal(ks[11], (F_int,), f32))

    # psi branch: Conv2d(F_int, 1, 1) + BN(1)
    wp = conv_w(ks[12], 1, F_int)
    bp = jax.random.normal(ks[13], (1,), f32) * 0.05
    gp = 1.0 + 0.1 * jax.random.normal(ks[14], (1,), f32)
    btp = jnp.zeros((1,), f32)
    mp = jnp.zeros((1,), f32)
    vp = 1.0 + 0.1 * jnp.abs(jax.random.normal(ks[15], (1,), f32))

    wx_f, bx_f = fold_conv_bn(wx, bx, gx, btx, mx, vx)
    wg_f, bg_f = fold_conv_bn(wg, bg, gg, btg, mg, vg)
    wp_f, bp_f = fold_conv_bn(wp, bp, gp, btp, mp, vp)

    return {"wx": wx_f, "bx": bx_f,
            "wg": wg_f, "bg": bg_f,
            "wp": wp_f, "bp": bp_f}


# ----------------------------------------------------------------------------
# Pure-JAX reference (same math, NCHW, no Pallas) for correctness checks.
# ----------------------------------------------------------------------------
def attention_gate_ref(x, g, p):
    hi = jax.lax.Precision.HIGHEST
    x1 = jnp.einsum("oc,nchw->nohw", p["wx"], x, precision=hi) \
        + p["bx"][None, :, None, None]
    g1 = jnp.einsum("oc,nchw->nohw", p["wg"], g, precision=hi) \
        + p["bg"][None, :, None, None]
    r = jnp.maximum(x1 + g1, 0.0)
    logit = jnp.einsum("oc,nchw->nohw", p["wp"], r, precision=hi) \
        + p["bp"][None, :, None, None]
    return x * jax.nn.sigmoid(logit)


def _run_case(key, N, F_g, F_l, F_int, H, W):
    k_x, k_g, k_p = jax.random.split(key, 3)
    x = jax.random.normal(k_x, (N, F_l, H, W), jnp.float32)
    g = jax.random.normal(k_g, (N, F_g, H, W), jnp.float32)
    params = make_params(k_p, F_g, F_l, F_int)

    out = attention_gate_pallas(x, g, params)
    out = jax.block_until_ready(out)

    ref = attention_gate_ref(x, g, params)
    np.testing.assert_allclose(np.asarray(out), np.asarray(ref),
                               rtol=1e-5, atol=1e-5)


if __name__ == "__main__":
    key = jax.random.PRNGKey(0)
    k1, k2 = jax.random.split(key, 2)

    # Unaligned channel counts -> exercises the split (two-dot accumulate) path.
    _run_case(k1, N=2, F_g=6, F_l=4, F_int=8, H=16, W=16)
    # Sublane-aligned channel counts -> exercises the fused single-matmul path.
    _run_case(k2, N=2, F_g=8, F_l=8, F_int=16, H=16, W=16)

    print("KERNEL_OK")
</pallas_src>

<mosaic_0001>
module attributes {stable_mosaic.version = 11 : i64} {
  func.func @attn_gate_kernel_split(%arg0: i32, %arg1: i32, %arg2: memref<1x4x256xf32, #tpu.memory_space<vmem>>, %arg3: memref<1x6x256xf32, #tpu.memory_space<vmem>>, %arg4: memref<8x4xf32, #tpu.memory_space<vmem>>, %arg5: memref<8x6xf32, #tpu.memory_space<vmem>>, %arg6: memref<8x1xf32, #tpu.memory_space<vmem>>, %arg7: memref<8x1xf32, #tpu.memory_space<vmem>>, %arg8: memref<1x1xf32, #tpu.memory_space<vmem>>, %arg9: memref<1x4x256xf32, #tpu.memory_space<vmem>>) attributes {dimension_semantics = [#tpu.dimension_semantics<parallel>, #tpu.dimension_semantics<parallel>], iteration_bounds = array<i64: 2, 1>, scalar_prefetch = 0 : i64, scratch_operands = 0 : i64, tpu.core_type = #tpu.core_type<tc>, window_params = [{transform_indices = @transform_0, window_bounds = array<i64: 1, 4, 256>}, {transform_indices = @transform_1, window_bounds = array<i64: 1, 6, 256>}, {pipeline_mode = #tpu.pipeline_mode<synchronous>, transform_indices = @transform_2, window_bounds = array<i64: 8, 4>}, {pipeline_mode = #tpu.pipeline_mode<synchronous>, transform_indices = @transform_3, window_bounds = array<i64: 8, 6>}, {pipeline_mode = #tpu.pipeline_mode<synchronous>, transform_indices = @transform_4, window_bounds = array<i64: 8, 1>}, {pipeline_mode = #tpu.pipeline_mode<synchronous>, transform_indices = @transform_5, window_bounds = array<i64: 8, 1>}, {pipeline_mode = #tpu.pipeline_mode<synchronous>, transform_indices = @transform_6, window_bounds = array<i64: 1, 1>}, {transform_indices = @transform_7, window_bounds = array<i64: 1, 4, 256>}]} {
    %c0 = arith.constant 0 : index
    %c0_0 = arith.constant 0 : index
    %c0_1 = arith.constant 0 : index
    %0 = vector.load %arg2[%c0, %c0_0, %c0_1] : memref<1x4x256xf32, #tpu.memory_space<vmem>>, vector<1x4x256xf32>
    %1 = vector.shape_cast %0 : vector<1x4x256xf32> to vector<4x256xf32>
    %c0_2 = arith.constant 0 : index
    %c0_3 = arith.constant 0 : index
    %c0_4 = arith.constant 0 : index
    %2 = vector.load %arg3[%c0_2, %c0_3, %c0_4] : memref<1x6x256xf32, #tpu.memory_space<vmem>>, vector<1x6x256xf32>
    %3 = vector.shape_cast %2 : vector<1x6x256xf32> to vector<6x256xf32>
    %c0_5 = arith.constant 0 : index
    %c0_6 = arith.constant 0 : index
    %4 = vector.load %arg4[%c0_5, %c0_6] : memref<8x4xf32, #tpu.memory_space<vmem>>, vector<8x4xf32>
    %cst = arith.constant dense<0.000000e+00> : vector<8x256xf32>
    %5 = tpu.matmul %4, %1, %cst {dimension_numbers = #tpu.dot_dimension_numbers<[1], [0], [0], [1], [0, 0, 1, 1], [], []>} : vector<8x4xf32>, vector<4x256xf32>, vector<8x256xf32> -> vector<8x256xf32>
    %c0_7 = arith.constant 0 : index
    %c0_8 = arith.constant 0 : index
    %6 = vector.load %arg5[%c0_7, %c0_8] : memref<8x6xf32, #tpu.memory_space<vmem>>, vector<8x6xf32>
    %cst_9 = arith.constant dense<0.000000e+00> : vector<8x256xf32>
    %7 = tpu.matmul %6, %3, %cst_9 {dimension_numbers = #tpu.dot_dimension_numbers<[1], [0], [0], [1], [0, 0, 1, 1], [], []>} : vector<8x6xf32>, vector<6x256xf32>, vector<8x256xf32> -> vector<8x256xf32>
    %8 = arith.addf %5, %7 : vector<8x256xf32>
    %c0_10 = arith.constant 0 : index
    %c0_11 = arith.constant 0 : index
    %9 = vector.load %arg6[%c0_10, %c0_11] : memref<8x1xf32, #tpu.memory_space<vmem>>, vector<8x1xf32>
    %c0_12 = arith.constant 0 : index
    %c0_13 = arith.constant 0 : index
    %10 = vector.load %arg7[%c0_12, %c0_13] : memref<8x1xf32, #tpu.memory_space<vmem>>, vector<8x1xf32>
    %c0_14 = arith.constant 0 : index
    %c0_15 = arith.constant 0 : index
    %11 = vector.load %arg8[%c0_14, %c0_15] : memref<1x1xf32, #tpu.memory_space<vmem>>, vector<1x1xf32>
    %12 = vector.broadcast %9 : vector<8x1xf32> to vector<8x256xf32>
    %13 = arith.addf %8, %12 : vector<8x256xf32>
    %cst_16 = arith.constant 0.000000e+00 : f32
    %14 = vector.broadcast %cst_16 : f32 to vector<8x256xf32>
    %15 = arith.maximumf %13, %14 : vector<8x256xf32>
    %16 = vector.broadcast %10 : vector<8x1xf32> to vector<8x256xf32>
    %17 = arith.mulf %15, %16 : vector<8x256xf32>
    %cst_17 = arith.constant dense<0.000000e+00> : vector<256xf32>
    %18 = vector.multi_reduction <add>, %17, %cst_17 [0] : vector<8x256xf32> to vector<256xf32>
    %19 = vector.shape_cast %18 : vector<256xf32> to vector<1x256xf32>
    %20 = vector.broadcast %11 : vector<1x1xf32> to vector<1x256xf32>
    %21 = arith.addf %19, %20 : vector<1x256xf32>
    %22 = arith.negf %21 : vector<1x256xf32>
    %23 = math.exp %22 : vector<1x256xf32>
    %cst_18 = arith.constant 1.000000e+00 : f32
    %24 = vector.broadcast %cst_18 : f32 to vector<1x256xf32>
    %25 = arith.addf %24, %23 : vector<1x256xf32>
    %26 = arith.divf %24, %25 : vector<1x256xf32>
    %27 = vector.broadcast %26 : vector<1x256xf32> to vector<4x256xf32>
    %28 = arith.mulf %1, %27 : vector<4x256xf32>
    %c0_19 = arith.constant 0 : index
    %c0_20 = arith.constant 0 : index
    %c0_21 = arith.constant 0 : index
    %29 = vector.load %arg9[%c0_19, %c0_20, %c0_21] : memref<1x4x256xf32, #tpu.memory_space<vmem>>, vector<1x4x256xf32>
    %30 = vector.shape_cast %29 : vector<1x4x256xf32> to vector<4x256xf32>
    %31 = vector.shape_cast %28 : vector<4x256xf32> to vector<1x4x256xf32>
    tpu.vector_store %arg9[%c0_19, %c0_20, %c0_21], %31 {strides = array<i32>} : memref<1x4x256xf32, #tpu.memory_space<vmem>>, vector<1x4x256xf32>,
    return
  }
  func.func @transform_0(%arg0: i32, %arg1: i32) -> (i32, i32, i32) {
    %c0_i32 = arith.constant 0 : i32
    %c0_i32_0 = arith.constant 0 : i32
    return %arg0, %c0_i32, %arg1 : i32, i32, i32
  }
  func.func @transform_1(%arg0: i32, %arg1: i32) -> (i32, i32, i32) {
    %c0_i32 = arith.constant 0 : i32
    %c0_i32_0 = arith.constant 0 : i32
    return %arg0, %c0_i32, %arg1 : i32, i32, i32
  }
  func.func @transform_2(%arg0: i32, %arg1: i32) -> (i32, i32) {
    %c0_i32 = arith.constant 0 : i32
    %c0_i32_0 = arith.constant 0 : i32
    %c0_i32_1 = arith.constant 0 : i32
    return %c0_i32, %c0_i32_0 : i32, i32
  }
  func.func @transform_3(%arg0: i32, %arg1: i32) -> (i32, i32) {
    %c0_i32 = arith.constant 0 : i32
    %c0_i32_0 = arith.constant 0 : i32
    %c0_i32_1 = arith.constant 0 : i32
    return %c0_i32, %c0_i32_0 : i32, i32
  }
  func.func @transform_4(%arg0: i32, %arg1: i32) -> (i32, i32) {
    %c0_i32 = arith.constant 0 : i32
    %c0_i32_0 = arith.constant 0 : i32
    %c0_i32_1 = arith.constant 0 : i32
    return %c0_i32, %c0_i32_0 : i32, i32
  }
  func.func @transform_5(%arg0: i32, %arg1: i32) -> (i32, i32) {
    %c0_i32 = arith.constant 0 : i32
    %c0_i32_0 = arith.constant 0 : i32
    %c0_i32_1 = arith.constant 0 : i32
    return %c0_i32, %c0_i32_0 : i32, i32
  }
  func.func @transform_6(%arg0: i32, %arg1: i32) -> (i32, i32) {
    %c0_i32 = arith.constant 0 : i32
    %c0_i32_0 = arith.constant 0 : i32
    %c0_i32_1 = arith.constant 0 : i32
    return %c0_i32, %c0_i32_0 : i32, i32
  }
  func.func @transform_7(%arg0: i32, %arg1: i32) -> (i32, i32, i32) {
    %c0_i32 = arith.constant 0 : i32
    %c0_i32_0 = arith.constant 0 : i32
    return %arg0, %c0_i32, %arg1 : i32, i32, i32
  }
}

</mosaic_0001>

<bundles_post_ra>
// kernel: tpu_custom_call.1
= control target key start
LH: loop header
LB: loop body
LE: loop exit
PB: predicated region body
PF: predicated region fallthrough
CT: control target
= control target key end

     0   :  { %s1041_s0 = inlined_call_operand.vmem [shape: f32[2,4,256], index: 0, kind: input, shape index: {}]   ;;  %s1042_s1 = inlined_call_operand.vmem [shape: f32[2,6,256], index: 1, kind: input, shape index: {}]   ;;  %s1043_s2 = inlined_call_operand.vmem [shape: f32[8,4], index: 2, kind: input, shape index: {}]   ;;  %s1044_s3 = inlined_call_operand.vmem [shape: f32[8,6], index: 3, kind: input, shape index: {}]   ;;  %s1045_s4 = inlined_call_operand.vmem [shape: f32[8,1], index: 4, kind: input, shape index: {}]   ;;  %s1046_s5 = inlined_call_operand.vmem [shape: f32[8,1], index: 5, kind: input, shape index: {}]   ;;  %s1047_s6 = inlined_call_operand.<no memory space> [shape: f32[1,1], index: 6, kind: input, shape index: {}]   ;;  %s1048_s7 = inlined_call_operand.hbm [shape: f32[2,4,256], index: 7, kind: output, shape index: {}]  }
   0x1   :  { %v12_v0 = vstv %s1047_s6 }
   0x2   :  { %13 = vst [vmem:[#allocation2] sm:$0x1] %v12_v0 }
   0x3   :  { %14 = vsyncpa [#allocation4], 0 }
   0x4   :  { %16 = vsyncpa [#allocation4 + $0x1], 0  ;;  %s908_s26 = smov 0   ;;  %s910_s27 = smov 0  }
   0x5   :  { %s912_s28 = smov 0   ;;  %s914_s29 = smov 0  }
   0x6   :  { %s916_s30 = smov 0   ;;  %s918_s8 = smov 0  }
   0x7 LB: > { %s686_s6 = sadd.s32 4294967295, %s860_s8   ;;  %s687_s9 = sadd.s32 4294967294, %s860_s8   ;;  %s860_s8 = sphi %s918_s8, %s22_s8   ;;  %s856_s30 = sphi %s916_s30, %s1055_s30   ;;  %s852_s29 = sphi %s914_s29, %s1054_s29   ;;  %s848_s28 = sphi %s912_s28, %s1053_s28   ;;  %s844_s27 = sphi %s910_s27, %s1052_s27   ;;  %s840_s26 = sphi %s908_s26, %s1051_s26  }
   0x8   : > { %s34_s10 = sadd.s32 1, %s856_s30  ;;  %s204_s11 = sadd.s32 1, %s848_s28 }
   0x9   : > { %p36_p0 = scmp.ge.s32.totalorder %s34_s10, 2  ;;  %p214_p1 = scmp.ne.s32.totalorder %s848_s28, %s844_s27 }
   0xa   : > { %p215_p2 = scmp.eq.s32.totalorder %s686_s6, 1  ;;  %p220_p3 = scmp.ne.s32.totalorder %s844_s27, %s840_s26 }
   0xb   : > { %s1057_s10 = smov (%p36_p0, %s34_s10), 0  ;;  %p221_p5 = scmp.eq.s32.totalorder %s687_s9, 1 }
   0xc   : > { %p948_p4 = por %p215_p2, %p214_p1  ;;  %s199_s13 = ssub.s32 %s856_s30, %s1057_s10 }
   0xd   : > { %p690_p6 = scmp.ge.s32.totalorder %s860_s8, 1  ;;  %p202_p7 = scmp.eq.s32.totalorder %s199_s13, 0 }
   0xe   : > { %p955_p8 = por %p221_p5, %p220_p3  ;;  %p280_p9 = scmp.lt.s32.totalorder %s860_s8, 3 }
   0xf   : > { %s961_s15 = scalar_select %p202_p7, %s848_s28, %s204_s11  }
  0x10   : > { %p281_p10 = pnand %p690_p6, %p280_p9 }
  0x11   : > { %p326_p11 = scmp.lt.s32.totalorder (!%p281_p10), %s852_s29, 1  ;;  %v862_v1 = vmov (!%p281_p10), 0.0   ;;  %v515_v2 = vld [vmem:[%s1045_s4] sm:$0xff] (!%p281_p10)  ;;  %v863_v3 = vmov (!%p281_p10), 0   ;;  %vm355_vm0 = vcmask (!%p281_p10), 1045504   ;;  %vm439_vm1 = vcmask (!%p281_p10), 1043456  }
  0x12   : > { %284 = sbr.rel (%p281_p10) target bundleno = 314 (0x13a), region = 48  ;;  %426 = vmatprep.mubr.f32.mxu1 (!%p281_p10), %v862_v1  ;;  %508 = vmatprep.mubr.f32.mxu0 (!%p281_p10), %v862_v1  ;;  %v517_v4 = vld [vmem:[#allocation2] sm:$0x1] (!%p281_p10)  ;;  %vm351_vm2 = vcmask (!%p281_p10), 48128   ;;  %vm435_vm3 = vcmask (!%p281_p10), 31744   ;;  %v551_v22 = vlaneseq (!%p281_p10)  ;;  %s711_s21 = sshll.u32 (!%p281_p10), %s852_s29, 7 }
  0x13   : > { %771 = vset.pattern.permute.xlu0 (!%p281_p10), %v863_v3  ;;  %772 = vset.pattern.permute.xlu1 (!%p281_p10), %v863_v3  ;;  %v516_v5 = vld [vmem:[%s1046_s5] sm:$0xff] (!%p281_p10)  ;;  %s994_s6 = scalar_lea.hbm (!%p281_p10), %s1048_s7, %s711_s21 }
  0x14   : > { %520 = vperm.xlu0 (!%p281_p10), %771, %v515_v2   ;;  %548 = vperm.xlu1 (!%p281_p10), %772, %v517_v4   ;;  %v350_v6 = vld [vmem:[%s1044_s3] sm:$0xff] (!%p281_p10)  ;;  %v552_v28 = vshrl.u32 (!%p281_p10), %v551_v22, 7 }
  0x15   : > { %v349_v11 = vld [vmem:[%s1043_s2] sm:$0xff] (!%p281_p10) }
  0x16   : > { %v553_v33 = vsub.s32 (!%p281_p10), 0, %v552_v28 }
  0x18   : > { %529 = vperm.xlu0 (!%p281_p10), %771, %v516_v5  }
  0x19   : > { %s327_s18 = scalar_select %p326_p11, %s852_s29, 1 }
  0x1a   : > { %s864_s29 = smov [#allocation3]  }
  0x1b   : > { %s710_s19 = sshll.u32 %s327_s18, 4  ;;  %s709_s20 = sshll.u32 %s327_s18, 3 }
  0x1c   : > { %s343_s25 = scalar_lea.vmem %s1042_s1, %s710_s19  ;;  %s333_s11 = scalar_lea.vmem %s1041_s0, %s709_s20 }
  0x1d   : > { %v348_v7 = vld [vmem:[%s343_s25 + $0x8] sm:$0x3f]  ;;  %v347_v8 = vld [vmem:[%s343_s25] sm:$0x3f]  ;;  %s322_s19 = sand.u32 1, %s844_s27   ;;  %s786_s13 = sshll.u32 %s864_s29, 4  ;;  %s787_s13 = int_to_ptr.vmem [resolvable:$false] %s786_s13 }
  0x1e   : > { %v980_v9 = vld [vmem:[%s333_s11] sm:$0xff]  ;;  %696 = vmatprep.subr.msk.mxu1 %vm355_vm0, %v348_v7  ;;  %s691_s20 = sshll.u32 %s322_s19, 3  ;;  %s576_s9 = scalar_lea.sflag [#allocation4], %s322_s19 }
  0x1f   : > { %v434_v10 = vcombine.high %v980_v9, %v980_v9  ;;  %697 = vmatpush1.msk.msra.mxu1 %vm355_vm0, %v347_v8  ;;  %s324_s22 = scalar_lea.vmem [#allocation3], %s691_s20  ;;  %s788_s16 = scalar_lea.vmem %s787_s13, 256 }
  0x20   : > { %698 = vmatmul.mubr.msk.f32.vlgmr.msra.gmra.mrb[0].mxu1 %vm351_vm2, %v350_v6  ;;  %s592_s23 = sshll.u32 %s324_s22, 4  ;;  %s996_s23 = int_to_ptr.vmem [resolvable:$true] %s592_s23 }
  0x21   : > { %699 = vmatprep.subr.msk.mxu0 %vm439_vm1, %v434_v10  ;;  %s782_s11 = scalar_lea.vmem %s996_s23, 128  ;;  %p789_p1 = scmp.lt.s32.totalorder %s996_s23, %s787_s13 }
  0x22   : > { %700 = vmatpush1.msk.msra.mxu0 %vm439_vm1, %v980_v9  ;;  %p783_p12 = scmp.ne.s32.totalorder %s996_s23, %s782_s11  ;;  %p790_p2 = scmp.lt.s32.totalorder %s788_s16, %s782_s11 }
  0x23   : > { %701 = vmatmul.mubr.msk.f32.vlgmr.msra.gmra.mrb[0].mxu0 %vm435_vm3, %v349_v11 }
  0x24   : > { %p784_p13 = pnand %p783_p12, %p948_p4  ;;  %p791_p3 = por %p790_p2, %p789_p1 }
  0x26   : > { %p785_p0 = pneg %p784_p13 }
  0x28   : > { %p792_p5 = pnand %p791_p3, %p785_p0 }
  0x93   : > { %v521_v14 = vpop.permute.xlu0 %520  ;;  %v549_v35 = vpop.permute.xlu1 %548 }
  0x94   : > { %v554_v39 = vrot.slane %v549_v35, %v553_v33 }
  0x97   : > { %v530_v23 = vpop.permute.xlu0 %529 }
  0xf3   : > { %v428_v12 = vpop.f32.mrb[0].mxu1 }
  0xf4   : > { %v430_v13 = vpop.f32.mrb[1].mxu1 }
  0xf6   : > { %v510_v15 = vpop.f32.mrb[0].mxu0 }
  0xf7   : > { %v511_v16 = vadd.f32 %v510_v15, %v428_v12  ;;  %v512_v17 = vpop.f32.mrb[1].mxu0 }
  0xf8   : > { %v513_v18 = vadd.f32 %v512_v17, %v430_v13 }
  0xf9   : > { %v523_v19 = vadd.f32 %v521_v14, %v511_v16 }
  0xfa   : > { %v524_v20 = vadd.f32 %v521_v14, %v513_v18 }
  0xfb   : > { %v525_v21 = vmax.f32 %v523_v19, 0.0 }
  0xfc   : > { %v526_v24 = vmax.f32 %v524_v20, 0.0 }
  0xfd   : > { %v532_v25 = vmul.f32 %v530_v23, %v525_v21 }
  0xfe   : > { %v533_v26 = vmul.f32 %v530_v23, %v526_v24 }
  0xff   : > { %v534_v27 = vrot.slane %v532_v25, 4 }
 0x100   : > { %v540_v29 = vrot.slane %v533_v26, 4 }
 0x101   : > { %v535_v30 = vadd.f32 %v534_v27, %v532_v25 }
 0x102   : > { %v541_v31 = vadd.f32 %v540_v29, %v533_v26 }
 0x103   : > { %v536_v32 = vrot.slane %v535_v30, 2 }
 0x104   : > { %v542_v34 = vrot.slane %v541_v31, 2 }
 0x105   : > { %v537_v36 = vadd.f32 %v536_v32, %v535_v30 }
 0x106   : > { %v543_v37 = vadd.f32 %v542_v34, %v541_v31 }
 0x107   : > { %v538_v38 = vrot.slane %v537_v36, 1 }
 0x108   : > { %v544_v40 = vrot.slane %v543_v37, 1 }
 0x109   : > { %v539_v41 = vadd.f32 %v538_v38, %v537_v36 }
 0x10a   : > { %v545_v42 = vadd.f32 %v544_v40, %v543_v37 }
 0x10b   : > { %v555_v43 = vadd.f32 %v554_v39, %v539_v41 }
 0x10c   : > { %v556_v44 = vadd.f32 %v554_v39, %v545_v42 }
 0x10d   : > { %v702_v45 = vmul.f32 -1.442695, %v555_v43 }
 0x10e   : > { %v703_v46 = vmul.f32 -1.442695, %v556_v44 }
 0x10f   : > { %774 = vpow2.f32 %v702_v45 }
 0x110   : > { %776 = vpow2.f32 %v703_v46 }
 0x119   : > { %v775_v47 = vpop.eup %774 }
 0x11a   : > { %v777_v48 = vpop.eup %776  ;;  %v563_v49 = vadd.f32 1.0, %v775_v47 }
 0x11b   : > { %v564_v50 = vadd.f32 1.0, %v777_v48 }
 0x11c   : > { %778 = vrcp.f32 %v563_v49 }
 0x11d   : > { %780 = vrcp.f32 %v564_v50 }
 0x126   : > { %v779_v51 = vpop.eup %778 }
 0x127   : > { %v781_v52 = vpop.eup %780 }
 0x128   : > { %v571_v53 = vcombine.low %v779_v51, %v781_v52 }
 0x12a   : > { %v573_v54 = vmul.f32 %v571_v53, %v980_v9 }
 0x12c   : > { %574 = vst [vmem:[%s324_s22] sm:$0xff] %v573_v54 }
 0x12d   : > { %795 = shalt.err (!%p792_p5)
}
 0x12e   : > { %s796_s17 = scalar_lea.hbm %s994_s6, 128  ;;  %s800_s20 = scalar_lea.hbm %s1048_s7, 256 }
 0x12f   : > { %p797_p6 = scmp.ne.s32.totalorder %s994_s6, %s796_s17  ;;  %p801_p10 = scmp.lt.u32.totalorder %s994_s6, %s1048_s7 }
 0x130   : > { %p802_p11 = scmp.lt.u32.totalorder %s800_s20, %s796_s17  ;;  %p804_p13 = scmp.lt.u32.totalorder %s796_s17, %s994_s6 }
 0x131   : > { %p798_p7 = pnand %p797_p6, %p948_p4 }
 0x132   : > { %p803_p12 = por %p802_p11, %p801_p10 }
 0x133   : > { %p799_p9 = pneg %p798_p7 }
 0x134   : > { %p805_p0 = por %p804_p13, %p803_p12 }
 0x136   : > { %p806_p1 = pnand %p805_p0, %p799_p9 }
 0x138   : > { %809 = shalt.err (!%p806_p1)
}
 0x139   : > { %714 = dma.vmem_to_hbm [thread:$0]  (%p948_p4), %s996_s23, 128, %s994_s6, %s576_s9  }
 0x13a PF: > { %p720_p2 = scmp.ge.s32.totalorder %s860_s8, 2  ;;  %s604_s24 = sand.u32 1, %s840_s26  }
 0x13b   : > { %s605_s25 = scalar_lea.sflag [#allocation4], %s604_s24 }
 0x13c   : > { %p717_p3 = pnand %p720_p2, %p955_p8 }
 0x13e   : > { %835 = dma.done.wait (!%p717_p3), %s605_s25, 128  }
 0x13f   : > { %837 = vsyncadd (!%p717_p3), %s605_s25, 4294967168  ;;  %s22_s8 = sadd.s32 1, %s860_s8   ;;  %s1051_s26 = smov %s844_s27 }
 0x140   : > { %p19_p5 = scmp.ge.s32.totalorder %s22_s8, 4   ;;  %s1052_s27 = smov %s848_s28 }
 0x141   : > { %s1053_s28 = smov %s961_s15  ;;  %s1054_s29 = smov %s856_s30 }
 0x142   : > { %s1055_s30 = smov %s1057_s10  ;;  %21 = sbr.rel (!%p19_p5) target bundleno = 7 (0x7), region = 86 }
 0x149   :  { %610 = vsyncpa [#allocation4], 1 }
 0x14a   :  { %612 = vsyncpa [#allocation4 + $0x1], 1 }

</bundles_post_ra>
